<compile_context>
chip_gen: v7x
topology: tpu7x:2x2x1
jax: 0.10.0
libtpu: 0.0.40
codegen_flags: <defaults>
</compile_context>

<pallas_src>
import functools

import jax
import jax.numpy as jnp
from jax import lax
from jax.experimental import pallas as pl
from jax.experimental.pallas import tpu as pltpu


def _leaky_relu(x, alpha=0.1):
    # max(x, alpha*x) == LeakyReLU(alpha) for alpha < 1; mul+max (2 VALU ops)
    # instead of cmp+mul+select (3).
    return jnp.maximum(x, alpha * x)


def lifter_kernel(x_ref, w_in_ref, w_hid_ref, w_out_t_ref, b_hid_ref,
                  b_out_ref, o_ref):
    # x block: (tile, in_dim), straight from the caller's (B, 2J) layout.
    x = x_ref[...]

    # (H, in_dim) contracted with (tile, in_dim) on in_dim -> (H, tile):
    # the batch lands on the 128-lane axis, so every following VPU op
    # (bias add, LeakyReLU, residual add) is lane-dense.
    h = lax.dot_general(w_in_ref[...], x, (((1,), (1,)), ((), ())),
                        preferred_element_type=jnp.float32)
    h = _leaky_relu(h + b_hid_ref[0])

    # three residual blocks (statically unrolled; static slab indices)
    for blk in range(3):
        y = jnp.dot(w_hid_ref[2 * blk], h, preferred_element_type=jnp.float32)
        y = _leaky_relu(y + b_hid_ref[2 * blk + 1])
        y = jnp.dot(w_hid_ref[2 * blk + 1], y,
                    preferred_element_type=jnp.float32)
        y = y + b_hid_ref[2 * blk + 2]
        h = _leaky_relu(h + y)

    # Linear(H, H) + LeakyReLU
    h = jnp.dot(w_hid_ref[6], h, preferred_element_type=jnp.float32)
    h = _leaky_relu(h + b_hid_ref[7])

    # Output projection directly into (tile, out_dim): transpose h on the XLU
    # (separate issue slot) and use a plain NN matmul against the
    # pre-transposed (H, out_dim) weight -> no wrapper-side output transpose.
    out = jnp.dot(h.T, w_out_t_ref[...], preferred_element_type=jnp.float32)
    o_ref[...] = (out + b_out_ref[...]).astype(o_ref.dtype)


def _const_spec(arr):
    # entire (tiny) parameter array resident in VMEM for every grid step
    ndim = arr.ndim
    return pl.BlockSpec(arr.shape, lambda i, _n=ndim: (0,) * _n)


def _round_up(v, m):
    return ((v + m - 1) // m) * m


@functools.partial(jax.jit, static_argnames=("batch_tile", "max_batch_tile"))
def lifter_forward(x, params, *, batch_tile=None, max_batch_tile=1024):
    """x: (B, 2*num_joints) float32 -> (B, 3*num_joints)."""
    B, in_dim = x.shape
    H = params["w_in"].shape[0]
    out_dim = params["w_out_t"].shape[1]

    if batch_tile is None:
        # * lane-dense tiles (multiple of 128), capped at max_batch_tile
        #   (1024 feeds the 9 serially-dependent matmuls without vreg spills),
        # * at least 2 grid steps once B_pad >= 256 (v7x has 2 TensorCores),
        # * tile = round_up(cdiv(B, steps), 128) so the last tile is not
        #   mostly padding.
        b_ceil = _round_up(B, 128)
        min_steps = 2 if b_ceil >= 256 else 1
        steps = max(min_steps, pl.cdiv(b_ceil, max_batch_tile))
        batch_tile = _round_up(pl.cdiv(B, steps), 128)
    assert batch_tile % 128 == 0

    grid = pl.cdiv(B, batch_tile)
    B_pad = grid * batch_tile
    x_p = jnp.pad(x, ((0, B_pad - B), (0, 0))) if B_pad != B else x

    in_specs = [
        pl.BlockSpec((batch_tile, in_dim), lambda i: (i, 0)),
        _const_spec(params["w_in"]),
        _const_spec(params["w_hid"]),
        _const_spec(params["w_out_t"]),
        _const_spec(params["b_hid"]),
        _const_spec(params["b_out"]),
    ]
    out_specs = pl.BlockSpec((batch_tile, out_dim), lambda i: (i, 0))

    # Advisory cost + explicit VMEM budget (2x-buffered I/O blocks + params +
    # live activations, with margin; clamped to a v7x-safe cap).
    param_bytes = 4 * (H * in_dim + 7 * H * H + H * out_dim + 8 * H + out_dim)
    flops = 2 * B_pad * (in_dim * H + 7 * H * H + H * out_dim)
    bytes_accessed = 4 * B_pad * (in_dim + out_dim) + param_bytes
    io_bytes = 4 * batch_tile * (in_dim + out_dim)
    act_bytes = 4 * batch_tile * H * 6
    vmem_limit = int(min(48 << 20,
                         max(16 << 20,
                             4 * (param_bytes + io_bytes) + 2 * act_bytes)))

    out = pl.pallas_call(
        lifter_kernel,
        out_shape=jax.ShapeDtypeStruct((B_pad, out_dim), x.dtype),
        grid_spec=pltpu.PrefetchScalarGridSpec(
            num_scalar_prefetch=0,
            grid=(grid,),
            in_specs=in_specs,
            out_specs=out_specs,
        ),
        compiler_params=pltpu.CompilerParams(
            dimension_semantics=("parallel",),
            vmem_limit_bytes=vmem_limit,
        ),
        cost_estimate=pl.CostEstimate(
            flops=flops, transcendentals=0, bytes_accessed=bytes_accessed),
    )(x_p, params["w_in"], params["w_hid"], params["w_out_t"],
      params["b_hid"], params["b_out"])

    return out[:B] if B_pad != B else out


def init_lifter_params(key, num_joints, hidden_dim):
    """Deterministic synthetic parameters, PyTorch-native (out, in) weights,
    packed into slabs: w_hid (7,H,H), b_hid (8,H,1); w_out pre-transposed."""
    H = hidden_dim
    in_dim = 2 * num_joints
    out_dim = 3 * num_joints

    def linear(k, d_out, d_in):
        kw, kb = jax.random.split(k)
        s = 1.0 / jnp.sqrt(d_in)
        w = jax.random.uniform(kw, (d_out, d_in), jnp.float32, -s, s)
        b = jax.random.uniform(kb, (d_out,), jnp.float32, -s, s)
        return w, b

    keys = jax.random.split(key, 9)
    w_in, b_in = linear(keys[0], H, in_dim)
    hidden = [linear(keys[1 + i], H, H) for i in range(7)]  # r1l1..r3l2, linA
    w_out, b_out = linear(keys[8], out_dim, H)

    w_hid = jnp.stack([w for w, _ in hidden])                # (7, H, H)
    b_hid = jnp.stack([b_in] + [b for _, b in hidden])       # (8, H)

    return {
        "w_in": w_in,                 # (H, 2J)   PyTorch (out, in)
        "w_hid": w_hid,               # (7, H, H) PyTorch (out, in)
        "w_out_t": w_out.T,           # (H, 3J)   pre-transposed for the kernel
        "b_hid": b_hid[:, :, None],   # (8, H, 1) column biases (batch on lanes)
        "b_out": b_out[None, :],      # (1, 3J)   row bias for (tile, 3J) output
    }


def lifter_reference(x, params):
    """Pure-JAX reference mirroring the PyTorch module (row-major math)."""
    w_in, w_hid = params["w_in"], params["w_hid"]
    w_out_t = params["w_out_t"]
    b_hid = params["b_hid"][..., 0]   # (8, H)
    b_out = params["b_out"]           # (1, 3J)

    h = _leaky_relu(x @ w_in.T + b_hid[0])
    for blk in range(3):
        y = _leaky_relu(h @ w_hid[2 * blk].T + b_hid[2 * blk + 1])
        y = y @ w_hid[2 * blk + 1].T + b_hid[2 * blk + 2]
        h = _leaky_relu(h + y)
    h = _leaky_relu(h @ w_hid[6].T + b_hid[7])
    return h @ w_out_t + b_out


if __name__ == "__main__":
    num_joints = 8       # input dim = 16, output dim = 24
    hidden_dim = 32
    batch = 200          # not a multiple of 128 -> padding path + 2 grid steps

    key = jax.random.PRNGKey(0)
    key, kx = jax.random.split(key)
    x = jax.random.normal(kx, (batch, 2 * num_joints), jnp.float32)
    params = init_lifter_params(key, num_joints, hidden_dim)

    out = jax.block_until_ready(lifter_forward(x, params))
    ref = lifter_reference(x, params)

    assert out.shape == (batch, 3 * num_joints)
    assert jnp.allclose(out, ref, atol=1e-4, rtol=1e-4), "mismatch vs reference"

    print("KERNEL_OK")
</pallas_src>

<mosaic_0001>
module attributes {stable_mosaic.version = 11 : i64} {
  func.func @lifter_kernel(%arg0: i32, %arg1: memref<128x16xf32, #tpu.memory_space<vmem>>, %arg2: memref<32x16xf32, #tpu.memory_space<vmem>>, %arg3: memref<7x32x32xf32, #tpu.memory_space<vmem>>, %arg4: memref<32x24xf32, #tpu.memory_space<vmem>>, %arg5: memref<8x32x1xf32, #tpu.memory_space<vmem>>, %arg6: memref<1x24xf32, #tpu.memory_space<vmem>>, %arg7: memref<128x24xf32, #tpu.memory_space<vmem>>) attributes {dimension_semantics = [#tpu.dimension_semantics<parallel>], iteration_bounds = array<i64: 2>, scalar_prefetch = 0 : i64, scratch_operands = 0 : i64, tpu.core_type = #tpu.core_type<tc>, window_params = [{transform_indices = @transform_0, window_bounds = array<i64: 128, 16>}, {pipeline_mode = #tpu.pipeline_mode<synchronous>, transform_indices = @transform_1, window_bounds = array<i64: 32, 16>}, {pipeline_mode = #tpu.pipeline_mode<synchronous>, transform_indices = @transform_2, window_bounds = array<i64: 7, 32, 32>}, {pipeline_mode = #tpu.pipeline_mode<synchronous>, transform_indices = @transform_3, window_bounds = array<i64: 32, 24>}, {pipeline_mode = #tpu.pipeline_mode<synchronous>, transform_indices = @transform_4, window_bounds = array<i64: 8, 32, 1>}, {pipeline_mode = #tpu.pipeline_mode<synchronous>, transform_indices = @transform_5, window_bounds = array<i64: 1, 24>}, {transform_indices = @transform_6, window_bounds = array<i64: 128, 24>}]} {
    %c0 = arith.constant 0 : index
    %c0_0 = arith.constant 0 : index
    %0 = vector.load %arg1[%c0, %c0_0] : memref<128x16xf32, #tpu.memory_space<vmem>>, vector<128x16xf32>
    %c0_1 = arith.constant 0 : index
    %c0_2 = arith.constant 0 : index
    %1 = vector.load %arg2[%c0_1, %c0_2] : memref<32x16xf32, #tpu.memory_space<vmem>>, vector<32x16xf32>
    %cst = arith.constant dense<0.000000e+00> : vector<32x128xf32>
    %2 = tpu.matmul %1, %0, %cst {dimension_numbers = #tpu.dot_dimension_numbers<[1], [1], [0], [0], [0, 0, 1, 0], [], []>} : vector<32x16xf32>, vector<128x16xf32>, vector<32x128xf32> -> vector<32x128xf32>
    %c0_3 = arith.constant 0 : index
    %c0_4 = arith.constant 0 : index
    %c0_5 = arith.constant 0 : index
    %3 = vector.load %arg5[%c0_3, %c0_4, %c0_5] : memref<8x32x1xf32, #tpu.memory_space<vmem>>, vector<1x32x1xf32>
    %4 = vector.shape_cast %3 : vector<1x32x1xf32> to vector<32x1xf32>
    %5 = vector.broadcast %4 : vector<32x1xf32> to vector<32x128xf32>
    %6 = arith.addf %2, %5 : vector<32x128xf32>
    %cst_6 = arith.constant 1.000000e-01 : f32
    %7 = vector.broadcast %cst_6 : f32 to vector<32x128xf32>
    %8 = arith.mulf %7, %6 : vector<32x128xf32>
    %9 = arith.maximumf %6, %8 : vector<32x128xf32>
    %c0_7 = arith.constant 0 : index
    %c0_8 = arith.constant 0 : index
    %c0_9 = arith.constant 0 : index
    %10 = vector.load %arg3[%c0_7, %c0_8, %c0_9] : memref<7x32x32xf32, #tpu.memory_space<vmem>>, vector<1x32x32xf32>
    %11 = vector.shape_cast %10 : vector<1x32x32xf32> to vector<32x32xf32>
    %cst_10 = arith.constant dense<0.000000e+00> : vector<32x128xf32>
    %12 = tpu.matmul %11, %9, %cst_10 {dimension_numbers = #tpu.dot_dimension_numbers<[1], [0], [0], [1], [0, 0, 1, 1], [], []>} : vector<32x32xf32>, vector<32x128xf32>, vector<32x128xf32> -> vector<32x128xf32>
    %c1 = arith.constant 1 : index
    %c0_11 = arith.constant 0 : index
    %c0_12 = arith.constant 0 : index
    %13 = vector.load %arg5[%c1, %c0_11, %c0_12] : memref<8x32x1xf32, #tpu.memory_space<vmem>>, vector<1x32x1xf32>
    %14 = vector.shape_cast %13 : vector<1x32x1xf32> to vector<32x1xf32>
    %15 = vector.broadcast %14 : vector<32x1xf32> to vector<32x128xf32>
    %16 = arith.addf %12, %15 : vector<32x128xf32>
    %cst_13 = arith.constant 1.000000e-01 : f32
    %17 = vector.broadcast %cst_13 : f32 to vector<32x128xf32>
    %18 = arith.mulf %17, %16 : vector<32x128xf32>
    %19 = arith.maximumf %16, %18 : vector<32x128xf32>
    %c1_14 = arith.constant 1 : index
    %c0_15 = arith.constant 0 : index
    %c0_16 = arith.constant 0 : index
    %20 = vector.load %arg3[%c1_14, %c0_15, %c0_16] : memref<7x32x32xf32, #tpu.memory_space<vmem>>, vector<1x32x32xf32>
    %21 = vector.shape_cast %20 : vector<1x32x32xf32> to vector<32x32xf32>
    %cst_17 = arith.constant dense<0.000000e+00> : vector<32x128xf32>
    %22 = tpu.matmul %21, %19, %cst_17 {dimension_numbers = #tpu.dot_dimension_numbers<[1], [0], [0], [1], [0, 0, 1, 1], [], []>} : vector<32x32xf32>, vector<32x128xf32>, vector<32x128xf32> -> vector<32x128xf32>
    %c2 = arith.constant 2 : index
    %c0_18 = arith.constant 0 : index
    %c0_19 = arith.constant 0 : index
    %23 = vector.load %arg5[%c2, %c0_18, %c0_19] : memref<8x32x1xf32, #tpu.memory_space<vmem>>, vector<1x32x1xf32>
    %24 = vector.shape_cast %23 : vector<1x32x1xf32> to vector<32x1xf32>
    %25 = vector.broadcast %24 : vector<32x1xf32> to vector<32x128xf32>
    %26 = arith.addf %22, %25 : vector<32x128xf32>
    %27 = arith.addf %9, %26 : vector<32x128xf32>
    %cst_20 = arith.constant 1.000000e-01 : f32
    %28 = vector.broadcast %cst_20 : f32 to vector<32x128xf32>
    %29 = arith.mulf %28, %27 : vector<32x128xf32>
    %30 = arith.maximumf %27, %29 : vector<32x128xf32>
    %c2_21 = arith.constant 2 : index
    %c0_22 = arith.constant 0 : index
    %c0_23 = arith.constant 0 : index
    %31 = vector.load %arg3[%c2_21, %c0_22, %c0_23] : memref<7x32x32xf32, #tpu.memory_space<vmem>>, vector<1x32x32xf32>
    %32 = vector.shape_cast %31 : vector<1x32x32xf32> to vector<32x32xf32>
    %cst_24 = arith.constant dense<0.000000e+00> : vector<32x128xf32>
    %33 = tpu.matmul %32, %30, %cst_24 {dimension_numbers = #tpu.dot_dimension_numbers<[1], [0], [0], [1], [0, 0, 1, 1], [], []>} : vector<32x32xf32>, vector<32x128xf32>, vector<32x128xf32> -> vector<32x128xf32>
    %c3 = arith.constant 3 : index
    %c0_25 = arith.constant 0 : index
    %c0_26 = arith.constant 0 : index
    %34 = vector.load %arg5[%c3, %c0_25, %c0_26] : memref<8x32x1xf32, #tpu.memory_space<vmem>>, vector<1x32x1xf32>
    %35 = vector.shape_cast %34 : vector<1x32x1xf32> to vector<32x1xf32>
    %36 = vector.broadcast %35 : vector<32x1xf32> to vector<32x128xf32>
    %37 = arith.addf %33, %36 : vector<32x128xf32>
    %cst_27 = arith.constant 1.000000e-01 : f32
    %38 = vector.broadcast %cst_27 : f32 to vector<32x128xf32>
    %39 = arith.mulf %38, %37 : vector<32x128xf32>
    %40 = arith.maximumf %37, %39 : vector<32x128xf32>
    %c3_28 = arith.constant 3 : index
    %c0_29 = arith.constant 0 : index
    %c0_30 = arith.constant 0 : index
    %41 = vector.load %arg3[%c3_28, %c0_29, %c0_30] : memref<7x32x32xf32, #tpu.memory_space<vmem>>, vector<1x32x32xf32>
    %42 = vector.shape_cast %41 : vector<1x32x32xf32> to vector<32x32xf32>
    %cst_31 = arith.constant dense<0.000000e+00> : vector<32x128xf32>
    %43 = tpu.matmul %42, %40, %cst_31 {dimension_numbers = #tpu.dot_dimension_numbers<[1], [0], [0], [1], [0, 0, 1, 1], [], []>} : vector<32x32xf32>, vector<32x128xf32>, vector<32x128xf32> -> vector<32x128xf32>
    %c4 = arith.constant 4 : index
    %c0_32 = arith.constant 0 : index
    %c0_33 = arith.constant 0 : index
    %44 = vector.load %arg5[%c4, %c0_32, %c0_33] : memref<8x32x1xf32, #tpu.memory_space<vmem>>, vector<1x32x1xf32>
    %45 = vector.shape_cast %44 : vector<1x32x1xf32> to vector<32x1xf32>
    %46 = vector.broadcast %45 : vector<32x1xf32> to vector<32x128xf32>
    %47 = arith.addf %43, %46 : vector<32x128xf32>
    %48 = arith.addf %30, %47 : vector<32x128xf32>
    %cst_34 = arith.constant 1.000000e-01 : f32
    %49 = vector.broadcast %cst_34 : f32 to vector<32x128xf32>
    %50 = arith.mulf %49, %48 : vector<32x128xf32>
    %51 = arith.maximumf %48, %50 : vector<32x128xf32>
    %c4_35 = arith.constant 4 : index
    %c0_36 = arith.constant 0 : index
    %c0_37 = arith.constant 0 : index
    %52 = vector.load %arg3[%c4_35, %c0_36, %c0_37] : memref<7x32x32xf32, #tpu.memory_space<vmem>>, vector<1x32x32xf32>
    %53 = vector.shape_cast %52 : vector<1x32x32xf32> to vector<32x32xf32>
    %cst_38 = arith.constant dense<0.000000e+00> : vector<32x128xf32>
    %54 = tpu.matmul %53, %51, %cst_38 {dimension_numbers = #tpu.dot_dimension_numbers<[1], [0], [0], [1], [0, 0, 1, 1], [], []>} : vector<32x32xf32>, vector<32x128xf32>, vector<32x128xf32> -> vector<32x128xf32>
    %c5 = arith.constant 5 : index
    %c0_39 = arith.constant 0 : index
    %c0_40 = arith.constant 0 : index
    %55 = vector.load %arg5[%c5, %c0_39, %c0_40] : memref<8x32x1xf32, #tpu.memory_space<vmem>>, vector<1x32x1xf32>
    %56 = vector.shape_cast %55 : vector<1x32x1xf32> to vector<32x1xf32>
    %57 = vector.broadcast %56 : vector<32x1xf32> to vector<32x128xf32>
    %58 = arith.addf %54, %57 : vector<32x128xf32>
    %cst_41 = arith.constant 1.000000e-01 : f32
    %59 = vector.broadcast %cst_41 : f32 to vector<32x128xf32>
    %60 = arith.mulf %59, %58 : vector<32x128xf32>
    %61 = arith.maximumf %58, %60 : vector<32x128xf32>
    %c5_42 = arith.constant 5 : index
    %c0_43 = arith.constant 0 : index
    %c0_44 = arith.constant 0 : index
    %62 = vector.load %arg3[%c5_42, %c0_43, %c0_44] : memref<7x32x32xf32, #tpu.memory_space<vmem>>, vector<1x32x32xf32>
    %63 = vector.shape_cast %62 : vector<1x32x32xf32> to vector<32x32xf32>
    %cst_45 = arith.constant dense<0.000000e+00> : vector<32x128xf32>
    %64 = tpu.matmul %63, %61, %cst_45 {dimension_numbers = #tpu.dot_dimension_numbers<[1], [0], [0], [1], [0, 0, 1, 1], [], []>} : vector<32x32xf32>, vector<32x128xf32>, vector<32x128xf32> -> vector<32x128xf32>
    %c6 = arith.constant 6 : index
    %c0_46 = arith.constant 0 : index
    %c0_47 = arith.constant 0 : index
    %65 = vector.load %arg5[%c6, %c0_46, %c0_47] : memref<8x32x1xf32, #tpu.memory_space<vmem>>, vector<1x32x1xf32>
    %66 = vector.shape_cast %65 : vector<1x32x1xf32> to vector<32x1xf32>
    %67 = vector.broadcast %66 : vector<32x1xf32> to vector<32x128xf32>
    %68 = arith.addf %64, %67 : vector<32x128xf32>
    %69 = arith.addf %51, %68 : vector<32x128xf32>
    %cst_48 = arith.constant 1.000000e-01 : f32
    %70 = vector.broadcast %cst_48 : f32 to vector<32x128xf32>
    %71 = arith.mulf %70, %69 : vector<32x128xf32>
    %72 = arith.maximumf %69, %71 : vector<32x128xf32>
    %c6_49 = arith.constant 6 : index
    %c0_50 = arith.constant 0 : index
    %c0_51 = arith.constant 0 : index
    %73 = vector.load %arg3[%c6_49, %c0_50, %c0_51] : memref<7x32x32xf32, #tpu.memory_space<vmem>>, vector<1x32x32xf32>
    %74 = vector.shape_cast %73 : vector<1x32x32xf32> to vector<32x32xf32>
    %cst_52 = arith.constant dense<0.000000e+00> : vector<32x128xf32>
    %75 = tpu.matmul %74, %72, %cst_52 {dimension_numbers = #tpu.dot_dimension_numbers<[1], [0], [0], [1], [0, 0, 1, 1], [], []>} : vector<32x32xf32>, vector<32x128xf32>, vector<32x128xf32> -> vector<32x128xf32>
    %c7 = arith.constant 7 : index
    %c0_53 = arith.constant 0 : index
    %c0_54 = arith.constant 0 : index
    %76 = vector.load %arg5[%c7, %c0_53, %c0_54] : memref<8x32x1xf32, #tpu.memory_space<vmem>>, vector<1x32x1xf32>
    %77 = vector.shape_cast %76 : vector<1x32x1xf32> to vector<32x1xf32>
    %78 = vector.broadcast %77 : vector<32x1xf32> to vector<32x128xf32>
    %79 = arith.addf %75, %78 : vector<32x128xf32>
    %cst_55 = arith.constant 1.000000e-01 : f32
    %80 = vector.broadcast %cst_55 : f32 to vector<32x128xf32>
    %81 = arith.mulf %80, %79 : vector<32x128xf32>
    %82 = arith.maximumf %79, %81 : vector<32x128xf32>
    %83 = tpu.transpose %82, [1, 0] : vector<32x128xf32> -> vector<128x32xf32>
    %c0_56 = arith.constant 0 : index
    %c0_57 = arith.constant 0 : index
    %84 = vector.load %arg4[%c0_56, %c0_57] : memref<32x24xf32, #tpu.memory_space<vmem>>, vector<32x24xf32>
    %cst_58 = arith.constant dense<0.000000e+00> : vector<128x24xf32>
    %85 = tpu.matmul %83, %84, %cst_58 {dimension_numbers = #tpu.dot_dimension_numbers<[1], [0], [0], [1], [0, 0, 1, 1], [], []>} : vector<128x32xf32>, vector<32x24xf32>, vector<128x24xf32> -> vector<128x24xf32>
    %c0_59 = arith.constant 0 : index
    %c0_60 = arith.constant 0 : index
    %86 = vector.load %arg6[%c0_59, %c0_60] : memref<1x24xf32, #tpu.memory_space<vmem>>, vector<1x24xf32>
    %87 = vector.broadcast %86 : vector<1x24xf32> to vector<128x24xf32>
    %88 = arith.addf %85, %87 : vector<128x24xf32>
    %c0_61 = arith.constant 0 : index
    %c0_62 = arith.constant 0 : index
    %89 = vector.load %arg7[%c0_61, %c0_62] : memref<128x24xf32, #tpu.memory_space<vmem>>, vector<128x24xf32>
    tpu.vector_store %arg7[%c0_61, %c0_62], %88 {strides = array<i32>} : memref<128x24xf32, #tpu.memory_space<vmem>>, vector<128x24xf32>,
    return
  }
  func.func @transform_0(%arg0: i32) -> (i32, i32) {
    %c0_i32 = arith.constant 0 : i32
    %c0_i32_0 = arith.constant 0 : i32
    return %arg0, %c0_i32 : i32, i32
  }
  func.func @transform_1(%arg0: i32) -> (i32, i32) {
    %c0_i32 = arith.constant 0 : i32
    %c0_i32_0 = arith.constant 0 : i32
    %c0_i32_1 = arith.constant 0 : i32
    return %c0_i32, %c0_i32_0 : i32, i32
  }
  func.func @transform_2(%arg0: i32) -> (i32, i32, i32) {
    %c0_i32 = arith.constant 0 : i32
    %c0_i32_0 = arith.constant 0 : i32
    %c0_i32_1 = arith.constant 0 : i32
    %c0_i32_2 = arith.constant 0 : i32
    return %c0_i32, %c0_i32_0, %c0_i32_1 : i32, i32, i32
  }
  func.func @transform_3(%arg0: i32) -> (i32, i32) {
    %c0_i32 = arith.constant 0 : i32
    %c0_i32_0 = arith.constant 0 : i32
    %c0_i32_1 = arith.constant 0 : i32
    return %c0_i32, %c0_i32_0 : i32, i32
  }
  func.func @transform_4(%arg0: i32) -> (i32, i32, i32) {
    %c0_i32 = arith.constant 0 : i32
    %c0_i32_0 = arith.constant 0 : i32
    %c0_i32_1 = arith.constant 0 : i32
    %c0_i32_2 = arith.constant 0 : i32
    return %c0_i32, %c0_i32_0, %c0_i32_1 : i32, i32, i32
  }
  func.func @transform_5(%arg0: i32) -> (i32, i32) {
    %c0_i32 = arith.constant 0 : i32
    %c0_i32_0 = arith.constant 0 : i32
    %c0_i32_1 = arith.constant 0 : i32
    return %c0_i32, %c0_i32_0 : i32, i32
  }
  func.func @transform_6(%arg0: i32) -> (i32, i32) {
    %c0_i32 = arith.constant 0 : i32
    %c0_i32_0 = arith.constant 0 : i32
    return %arg0, %c0_i32 : i32, i32
  }
}

</mosaic_0001>

<bundles_post_ra>
// kernel: lifter_forward.1
= control target key start
LH: loop header
LB: loop body
LE: loop exit
PB: predicated region body
PF: predicated region fallthrough
CT: control target
= control target key end

     0   :  { %s2283_s21 = smov 0   ;;  %s2680_s0 = inlined_call_operand.vmem [shape: f32[256,16], index: 0, kind: input, shape index: {}]   ;;  %s2681_s1 = inlined_call_operand.vmem [shape: f32[32,16], index: 1, kind: input, shape index: {}]   ;;  %s2682_s2 = inlined_call_operand.vmem [shape: f32[7,32,32], index: 2, kind: input, shape index: {}]   ;;  %s2683_s3 = inlined_call_operand.vmem [shape: f32[32,24], index: 3, kind: input, shape index: {}]   ;;  %s2684_s4 = inlined_call_operand.vmem [shape: f32[8,32,1], index: 4, kind: input, shape index: {}]   ;;  %s2685_s5 = inlined_call_operand.vmem [shape: f32[1,24], index: 5, kind: input, shape index: {}]   ;;  %s2686_s6 = inlined_call_operand.vmem [shape: f32[256,24], index: 6, kind: output, shape index: {}]  }
   0x1 LB: > { %s1719_s22 = sadd.s32 4294967295, %s2245_s21   ;;  %p1723_p0 = scmp.ge.s32.totalorder %s2245_s21, 1  ;;  %s2245_s21 = sphi %s2283_s21, %s16_s21  }
   0x2   : > { %p213_p1 = scmp.lt.s32.totalorder %s2245_s21, 3 }
   0x4   : > { %p214_p2 = pnand %p1723_p0, %p213_p1 }
   0x5   : > { %s1724_s23 = sshll.u32 (!%p214_p2), %s1719_s22, 4  ;;  %vm299_vm0 = vcmask (!%p214_p2), 130048   ;;  %v271_v0 = vld [vmem:[%s2681_s1] sm:$0xff] (!%p214_p2)  ;;  %v2247_v1 = vmov (!%p214_p2), 0   ;;  %v277_v3 = vld [vmem:[%s2684_s4 + $0x10] sm:$0xff] (!%p214_p2)  ;;  %v276_v4 = vld [vmem:[%s2684_s4 + $0x8] sm:$0xff] (!%p214_p2) }
   0x6   : > { %217 = sbr.rel (%p214_p2) target bundleno = 2316 (0x90c), region = 44  ;;  %p244_p3 = scmp.lt.s32.totalorder (!%p214_p2), %s1724_s23, 31  ;;  %1975 = vmatprep.mubr.msk.f32.mxu0 (!%p214_p2), %vm299_vm0, %v271_v0  ;;  %2237 = vset.pattern.permute.xlu0 (!%p214_p2), %v2247_v1  ;;  %v275_v2 = vld [vmem:[%s2684_s4] sm:$0xff] (!%p214_p2)  ;;  %v278_v5 = vld [vmem:[%s2684_s4 + $0x18] sm:$0xff] (!%p214_p2)  ;;  %vm2319_vm1 = vmpackc.low (!%p214_p2), %vm299_vm0, %vm299_vm0  ;;  %vm482_vm2 = vcmask (!%p214_p2), 261120   ;;  %vm1646_vm3 = vcmask (!%p214_p2), 195584  }
   0x7   : > { %281 = vperm.xlu0 (!%p214_p2), %2237, %v275_v2   ;;  %2238 = vset.pattern.permute.xlu1 (!%p214_p2), %v2247_v1  ;;  %v1748_v7 = vld [vmem:[%s2684_s4 + $0x20] sm:$0xff] (!%p214_p2)  ;;  %v1749_v13 = vld [vmem:[%s2684_s4 + $0x28] sm:$0xff] (!%p214_p2)  ;;  %v1750_v15 = vld [vmem:[%s2684_s4 + $0x30] sm:$0xff] (!%p214_p2) }
   0x8   : > { %291 = vperm.xlu1 (!%p214_p2), %2238, %v277_v3   ;;  %v1751_v16 = vld [vmem:[%s2684_s4 + $0x38] sm:$0xff] (!%p214_p2)  ;;  %v1760_v19 = vld [vmem:[%s2684_s4 + $0x40] sm:$0xff] (!%p214_p2)  ;;  %v1761_v21 = vld [vmem:[%s2684_s4 + $0x48] sm:$0xff] (!%p214_p2) }
   0x9   : > { %v1762_v22 = vld [vmem:[%s2684_s4 + $0x50] sm:$0xff] (!%p214_p2)  ;;  %v1763_v23 = vld [vmem:[%s2684_s4 + $0x58] sm:$0xff] (!%p214_p2)  ;;  %v1772_v26 = vld [vmem:[%s2684_s4 + $0x60] sm:$0xff] (!%p214_p2) }
   0xa   : > { %v1773_v28 = vld [vmem:[%s2684_s4 + $0x68] sm:$0xff] (!%p214_p2)  ;;  %v1774_v29 = vld [vmem:[%s2684_s4 + $0x70] sm:$0xff] (!%p214_p2)  ;;  %v1775_v30 = vld [vmem:[%s2684_s4 + $0x78] sm:$0xff] (!%p214_p2) }
   0xb   : > { %286 = vperm.xlu0 (!%p214_p2), %2237, %v276_v4   ;;  %v1784_v33 = vld [vmem:[%s2684_s4 + $0x80] sm:$0xff] (!%p214_p2)  ;;  %v1785_v35 = vld [vmem:[%s2684_s4 + $0x88] sm:$0xff] (!%p214_p2)  ;;  %v1786_v36 = vld [vmem:[%s2684_s4 + $0x90] sm:$0xff] (!%p214_p2) }
   0xc   : > { %296 = vperm.xlu1 (!%p214_p2), %2238, %v278_v5   ;;  %v1787_v37 = vld [vmem:[%s2684_s4 + $0x98] sm:$0xff] (!%p214_p2)  ;;  %v1796_v40 = vld [vmem:[%s2684_s4 + $0xa0] sm:$0xff] (!%p214_p2)  ;;  %v1797_v42 = vld [vmem:[%s2684_s4 + $0xa8] sm:$0xff] (!%p214_p2) }
   0xd   : > { %s2690_s23 = smov (!%p244_p3, %s1724_s23), 31  ;;  %v1798_v43 = vld [vmem:[%s2684_s4 + $0xb0] sm:$0xff]  ;;  %v1799_v44 = vld [vmem:[%s2684_s4 + $0xb8] sm:$0xff]  ;;  %v1808_v47 = vld [vmem:[%s2684_s4 + $0xc0] sm:$0xff] }
   0xe   : > { %s1725_s10 = sshll.u32 %s2690_s23, 3  ;;  %v1809_v49 = vld [vmem:[%s2684_s4 + $0xc8] sm:$0xff]  ;;  %v1810_v50 = vld [vmem:[%s2684_s4 + $0xd0] sm:$0xff]  ;;  %v1811_v51 = vld [vmem:[%s2684_s4 + $0xd8] sm:$0xff] }
   0xf   : > { %s2315_s13 = scalar_lea.vmem %s2680_s0, %s1725_s10  ;;  %464 = vperm.xlu0 %2237, %v1748_v7   ;;  %v1820_v54 = vld [vmem:[%s2684_s4 + $0xe0] sm:$0xff]  ;;  %v1821_v56 = vld [vmem:[%s2684_s4 + $0xe8] sm:$0xff]  ;;  %v1822_v57 = vld [vmem:[%s2684_s4 + $0xf0] sm:$0xff]  ;;  %s2643_s20 = scalar_lea.vmem %s2686_s6, %s1725_s10 }
  0x10   : > { %v255_v8 = vld [vmem:[%s2315_s13] sm:$0xff]  ;;  %v256_v9 = vld [vmem:[%s2315_s13 + $0x8] sm:$0xff]  ;;  %v257_v10 = vld [vmem:[%s2315_s13 + $0x10] sm:$0xff]  ;;  %469 = vperm.xlu1 %2238, %v1749_v13  }
  0x11   : > { %v2111_v11 = vpack.c.bf16 %v256_v9, %v255_v8  ;;  %v258_v12 = vld [vmem:[%s2315_s13 + $0x18] sm:$0xff]  ;;  %v259_v17 = vld [vmem:[%s2315_s13 + $0x20] sm:$0xff]  ;;  %v260_v18 = vld [vmem:[%s2315_s13 + $0x28] sm:$0xff] }
  0x12   : > { %v2117_v14 = vpack.c.bf16 %v258_v12, %v257_v10  ;;  %v2123_v20 = vpack.c.bf16 %v260_v18, %v259_v17  ;;  %v261_v24 = vld [vmem:[%s2315_s13 + $0x30] sm:$0xff]  ;;  %v262_v25 = vld [vmem:[%s2315_s13 + $0x38] sm:$0xff]  ;;  %v263_v31 = vld [vmem:[%s2315_s13 + $0x40] sm:$0xff] }
  0x13   : > { %2113 = vmatprep.subr.msk.bf16.mxu0 %vm2319_vm1, %v2111_v11  ;;  %474 = vperm.xlu0 %2237, %v1750_v15   ;;  %v2129_v27 = vpack.c.bf16 %v262_v25, %v261_v24  ;;  %v264_v32 = vld [vmem:[%s2315_s13 + $0x48] sm:$0xff]  ;;  %v265_v38 = vld [vmem:[%s2315_s13 + $0x50] sm:$0xff]  ;;  %v266_v39 = vld [vmem:[%s2315_s13 + $0x58] sm:$0xff] }
  0x14   : > { %2116 = vmatpush3.bf16.xpose.msk.msra.mxu0 %vm2319_vm1, %v2111_v11  ;;  %479 = vperm.xlu1 %2238, %v1751_v16   ;;  %v2135_v34 = vpack.c.bf16 %v264_v32, %v263_v31  ;;  %v2141_v41 = vpack.c.bf16 %v266_v39, %v265_v38  ;;  %v267_v45 = vld [vmem:[%s2315_s13 + $0x60] sm:$0xff]  ;;  %v268_v46 = vld [vmem:[%s2315_s13 + $0x68] sm:$0xff]  ;;  %v269_v52 = vld [vmem:[%s2315_s13 + $0x70] sm:$0xff] }
  0x15   : > { %2119 = vmatprep.subr.msk.bf16.mxu0 %vm2319_vm1, %v2117_v14  ;;  %v2147_v48 = vpack.c.bf16 %v268_v46, %v267_v45  ;;  %v270_v53 = vld [vmem:[%s2315_s13 + $0x78] sm:$0xff]  ;;  %v272_v59 = vld [vmem:[%s2681_s1 + $0x8] sm:$0xff]  ;;  %v273_v60 = vld [vmem:[%s2681_s1 + $0x10] sm:$0xff] }
  0x16   : > { %v2153_v55 = vpack.c.bf16 %v270_v53, %v269_v52  ;;  %v1823_v58 = vld [vmem:[%s2684_s4 + $0xf8] sm:$0xff]  ;;  %v453_v62 = vld [vmem:[%s2682_s2] sm:$0xff] }
  0x17   : > { %600 = vperm.xlu0 %2237, %v1760_v19   ;;  %v274_v61 = vld [vmem:[%s2681_s1 + $0x18] sm:$0xff]  ;;  %1989 = vmatprep.mubr.msk.f32.mxu1 %vm482_vm2, %v453_v62  ;;  %v1756_v24 = vld [vmem:[%s2682_s2 + $0x20] sm:$0xff] }
  0x18   : > { %605 = vperm.xlu1 %2238, %v1761_v21   ;;  %v454_v21 = vld [vmem:[%s2682_s2 + $0x8] sm:$0xff] }
  0x1b   : > { %610 = vperm.xlu0 %2237, %v1762_v22   ;;  %v455_v22 = vld [vmem:[%s2682_s2 + $0x10] sm:$0xff] }
  0x1c   : > { %2122 = vmatpush3.bf16.xpose.msk.msra.mxu0 %vm2319_vm1, %v2117_v14  ;;  %615 = vperm.xlu1 %2238, %v1763_v23   ;;  %v456_v23 = vld [vmem:[%s2682_s2 + $0x18] sm:$0xff] }
  0x1d   : > { %2125 = vmatprep.subr.msk.bf16.mxu0 %vm2319_vm1, %v2123_v20 }
  0x1f   : > { %739 = vperm.xlu0 %2237, %v1772_v26  }
  0x20   : > { %744 = vperm.xlu1 %2238, %v1773_v28  }
  0x23   : > { %749 = vperm.xlu0 %2237, %v1774_v29  }
  0x24   : > { %2128 = vmatpush3.bf16.xpose.msk.msra.mxu0 %vm2319_vm1, %v2123_v20  ;;  %754 = vperm.xlu1 %2238, %v1775_v30  }
  0x25   : > { %2131 = vmatprep.subr.msk.bf16.mxu0 %vm2319_vm1, %v2129_v27 }
  0x27   : > { %874 = vperm.xlu0 %2237, %v1784_v33  }
  0x28   : > { %879 = vperm.xlu1 %2238, %v1785_v35  }
  0x2b   : > { %884 = vperm.xlu0 %2237, %v1786_v36  }
  0x2c   : > { %2134 = vmatpush3.bf16.xpose.msk.msra.mxu0 %vm2319_vm1, %v2129_v27  ;;  %889 = vperm.xlu1 %2238, %v1787_v37  }
  0x2d   : > { %2137 = vmatprep.subr.msk.bf16.mxu0 %vm2319_vm1, %v2135_v34 }
  0x2f   : > { %1013 = vperm.xlu0 %2237, %v1796_v40  }
  0x30   : > { %1018 = vperm.xlu1 %2238, %v1797_v42  }
  0x33   : > { %1023 = vperm.xlu0 %2237, %v1798_v43  }
  0x34   : > { %2140 = vmatpush3.bf16.xpose.msk.msra.mxu0 %vm2319_vm1, %v2135_v34  ;;  %1028 = vperm.xlu1 %2238, %v1799_v44  }
  0x35   : > { %2143 = vmatprep.subr.msk.bf16.mxu0 %vm2319_vm1, %v2141_v41 }
  0x37   : > { %1148 = vperm.xlu0 %2237, %v1808_v47   ;;  %v1757_v47 = vld [vmem:[%s2682_s2 + $0x28] sm:$0xff] }
  0x38   : > { %1153 = vperm.xlu1 %2238, %v1809_v49   ;;  %v1759_v49 = vld [vmem:[%s2682_s2 + $0x38] sm:$0xff] }
  0x3b   : > { %1158 = vperm.xlu0 %2237, %v1810_v50   ;;  %v1768_v50 = vld [vmem:[%s2682_s2 + $0x40] sm:$0xff] }
  0x3c   : > { %2146 = vmatpush3.bf16.xpose.msk.msra.mxu0 %vm2319_vm1, %v2141_v41  ;;  %1163 = vperm.xlu1 %2238, %v1811_v51  }
  0x3d   : > { %2149 = vmatprep.subr.msk.bf16.mxu0 %vm2319_vm1, %v2147_v48 }
  0x3f   : > { %1287 = vperm.xlu0 %2237, %v1820_v54  }
  0x40   : > { %1292 = vperm.xlu1 %2238, %v1821_v56  }
  0x43   : > { %1297 = vperm.xlu0 %2237, %v1822_v57  }
  0x44   : > { %2152 = vmatpush3.bf16.xpose.msk.msra.mxu0 %vm2319_vm1, %v2147_v48  ;;  %1302 = vperm.xlu1 %2238, %v1823_v58   ;;  %v1758_v48 = vld [vmem:[%s2682_s2 + $0x30] sm:$0xff] }
  0x45   : > { %2155 = vmatprep.subr.msk.bf16.mxu0 %vm2319_vm1, %v2153_v55 }
  0x4c   : > { %2158 = vmatpush3.bf16.xpose.msk.msra.mxu0 %vm2319_vm1, %v2153_v55 }
  0x53   : > { %1976 = vmatmul.mubr.msk.f32.vlgmr.msra.gmra.mrb[0].mxu0 %vm299_vm0, %v272_v59 }
  0x54   : > { %1978 = vmatprep.mubr.msk.f32.mxu0 %vm299_vm0, %v273_v60 }
  0x57   : > { %1979 = vmatmul.mubr.msk.f32.gmra.mrb[2].mxu0 %vm299_vm0, %v274_v61 }
  0x86   : > { %v282_v63 = vpop.permute.xlu0 %281 }
  0x87   : > { %v292_v0 = vpop.permute.xlu1 %291 }
  0x8a   : > { %v287_v1 = vpop.permute.xlu0 %286 }
  0x8b   : > { %v297_v7 = vpop.permute.xlu1 %296 }
  0x8e   : > { %v465_v26 = vpop.permute.xlu0 %464 }
  0x8f   : > { %v470_v25 = vpop.permute.xlu1 %469 }
  0x92   : > { %v475_v35 = vpop.permute.xlu0 %474 }
  0x93   : > { %v480_v32 = vpop.permute.xlu1 %479 }
  0x96   : > { %v601_v52 = vpop.permute.xlu0 %600 }
  0x97   : > { %v606_v51 = vpop.permute.xlu1 %605 }
  0x9a   : > { %v611_v61 = vpop.permute.xlu0 %610 }
  0x9b   : > { %v616_v58 = vpop.permute.xlu1 %615 }
 0x126   : > { %v1977_v2 = vpop.f32.mrb[0].mxu0 }
 0x127   : > { %v432_v3 = vadd.f32 %v1977_v2, %v287_v1  ;;  %v426_v4 = vpop.f32.mrb[1].mxu0 }
 0x128   : > { %v427_v5 = vadd.f32 %v426_v4, %v282_v63 }
 0x129   : > { %v446_v6 = vmul.f32 0.1, %v432_v3 }
 0x12a   : > { %v445_v8 = vmul.f32 0.1, %v427_v5  ;;  %v1980_v9 = vpop.f32.mrb[2].mxu0 }
 0x12b   : > { %v2471_v10 = vmax.f32 %v432_v3, %v446_v6  ;;  %v442_v11 = vadd.f32 %v1980_v9, %v297_v7  ;;  %v436_v12 = vpop.f32.mrb[3].mxu0 }
 0x12c   : > { %v449_v13 = vmax.f32 %v427_v5, %v445_v8  ;;  %v437_v14 = vadd.f32 %v436_v12, %v292_v0 }
 0x12d   : > { %v448_v15 = vmul.f32 0.1, %v442_v11 }
 0x12e   : > { %v447_v16 = vmul.f32 0.1, %v437_v14  ;;  %v2159_v17 = vpack.c.bf16 %v2471_v10, %v449_v13 }
 0x12f   : > { %v2474_v18 = vmax.f32 %v442_v11, %v448_v15  ;;  %v1771_v15 = vld [vmem:[%s2682_s2 + $0x58] sm:$0xff] }
 0x130   : > { %v2476_v19 = vmax.f32 %v437_v14, %v447_v16  ;;  %2160 = vmatprep.subr.bf16.mxu1 %v2159_v17  ;;  %v1770_v14 = vld [vmem:[%s2682_s2 + $0x50] sm:$0xff]  ;;  %v1780_v16 = vld [vmem:[%s2682_s2 + $0x60] sm:$0xff] }
 0x131   : > { %2162 = vmatpush3.bf16.msra.mxu1 %v2159_v17  ;;  %v745_v17 = vpop.permute.xlu1 %744 }
 0x132   : > { %v2163_v20 = vpack.c.bf16 %v2474_v18, %v2476_v19 }
 0x134   : > { %2164 = vmatprep.subr.bf16.mxu1 %v2163_v20 }
 0x135   : > { %2166 = vmatpush3.bf16.msra.mxu1 %v2163_v20 }
 0x138   : > { %1990 = vmatmul.mubr.msk.f32.vlgmr.msra.gmra.mrb[0].mxu1 %vm482_vm2, %v454_v21 }
 0x139   : > { %1992 = vmatprep.mubr.msk.f32.mxu1 %vm482_vm2, %v455_v22 }
 0x13c   : > { %1993 = vmatmul.mubr.msk.f32.gmra.mrb[2].mxu1 %vm482_vm2, %v456_v23 }
 0x13d   : > { %2003 = vmatprep.mubr.msk.f32.mxu1 %vm482_vm2, %v1756_v24  ;;  %v755_v24 = vpop.permute.xlu1 %754 }
 0x20b   : > { %v1991_v27 = vpop.f32.mrb[0].mxu1 }
 0x20c   : > { %v567_v28 = vadd.f32 %v1991_v27, %v470_v25  ;;  %v561_v29 = vpop.f32.mrb[1].mxu1 }
 0x20d   : > { %v562_v30 = vadd.f32 %v561_v29, %v465_v26 }
 0x20e   : > { %v581_v31 = vmul.f32 0.1, %v567_v28 }
 0x20f   : > { %v580_v33 = vmul.f32 0.1, %v562_v30  ;;  %v1994_v34 = vpop.f32.mrb[2].mxu1 }
 0x210   : > { %v585_v36 = vmax.f32 %v567_v28, %v581_v31  ;;  %v577_v37 = vadd.f32 %v1994_v34, %v480_v32  ;;  %v571_v38 = vpop.f32.mrb[3].mxu1 }
 0x211   : > { %v584_v39 = vmax.f32 %v562_v30, %v580_v33  ;;  %v572_v40 = vadd.f32 %v571_v38, %v475_v35 }
 0x212   : > { %v583_v41 = vmul.f32 0.1, %v577_v37 }
 0x213   : > { %v582_v42 = vmul.f32 0.1, %v572_v40  ;;  %v2167_v43 = vpack.c.bf16 %v585_v36, %v584_v39  ;;  %v1781_v39 = vld [vmem:[%s2682_s2 + $0x68] sm:$0xff] }
 0x214   : > { %v587_v44 = vmax.f32 %v577_v37, %v583_v41  ;;  %v1783_v41 = vld [vmem:[%s2682_s2 + $0x78] sm:$0xff] }
 0x215   : > { %v586_v45 = vmax.f32 %v572_v40, %v582_v42  ;;  %2168 = vmatprep.subr.bf16.mxu1 %v2167_v43  ;;  %v1782_v40 = vld [vmem:[%s2682_s2 + $0x70] sm:$0xff]  ;;  %v1792_v42 = vld [vmem:[%s2682_s2 + $0x80] sm:$0xff] }
 0x216   : > { %2170 = vmatpush3.bf16.msra.mxu1 %v2167_v43  ;;  %v880_v43 = vpop.permute.xlu1 %879 }
 0x217   : > { %v2171_v46 = vpack.c.bf16 %v587_v44, %v586_v45 }
 0x219   : > { %2172 = vmatprep.subr.bf16.mxu1 %v2171_v46 }
 0x21a   : > { %2174 = vmatpush3.bf16.msra.mxu1 %v2171_v46 }
 0x21d   : > { %2004 = vmatmul.mubr.msk.f32.vlgmr.msra.gmra.mrb[4].mxu1 %vm482_vm2, %v1757_v47 }
 0x21e   : > { %2006 = vmatprep.mubr.msk.f32.mxu1 %vm482_vm2, %v1758_v48 }
 0x221   : > { %2007 = vmatmul.mubr.msk.f32.gmra.mrb[6].mxu1 %vm482_vm2, %v1759_v49 }
 0x222   : > { %2017 = vmatprep.mubr.msk.f32.mxu1 %vm482_vm2, %v1768_v50  ;;  %v890_v50 = vpop.permute.xlu1 %889 }
 0x2f0   : > { %v2005_v53 = vpop.f32.mrb[4].mxu1 }
 0x2f1   : > { %v702_v54 = vadd.f32 %v2005_v53, %v606_v51  ;;  %v696_v55 = vpop.f32.mrb[5].mxu1 }
 0x2f2   : > { %v697_v56 = vadd.f32 %v696_v55, %v601_v52 }
 0x2f3   : > { %v716_v57 = vadd.f32 %v702_v54, %v2471_v10 }
 0x2f4   : > { %v715_v59 = vadd.f32 %v697_v56, %v449_v13  ;;  %v2008_v60 = vpop.f32.mrb[6].mxu1  ;;  %v1769_v13 = vld [vmem:[%s2682_s2 + $0x48] sm:$0xff] }
 0x2f5   : > { %v720_v62 = vmul.f32 0.1, %v716_v57  ;;  %v712_v63 = vadd.f32 %v2008_v60, %v616_v58  ;;  %v706_v0 = vpop.f32.mrb[7].mxu1 }
 0x2f6   : > { %v719_v1 = vmul.f32 0.1, %v715_v59  ;;  %v707_v2 = vadd.f32 %v706_v0, %v611_v61 }
 0x2f7   : > { %v724_v3 = vmax.f32 %v716_v57, %v720_v62  ;;  %v718_v4 = vadd.f32 %v712_v63, %v2474_v18  ;;  %v740_v18 = vpop.permute.xlu0 %739 }
 0x2f8   : > { %v723_v5 = vmax.f32 %v715_v59, %v719_v1  ;;  %v717_v6 = vadd.f32 %v707_v2, %v2476_v19 }
 0x2f9   : > { %v722_v7 = vmul.f32 0.1, %v718_v4 }
 0x2fa   : > { %v721_v8 = vmul.f32 0.1, %v717_v6  ;;  %v2175_v9 = vpack.c.bf16 %v724_v3, %v723_v5 }
 0x2fb   : > { %v2515_v11 = vmax.f32 %v718_v4, %v722_v7  ;;  %v750_v27 = vpop.permute.xlu0 %749  ;;  %v1795_v7 = vld [vmem:[%s2682_s2 + $0x98] sm:$0xff] }
 0x2fc   : > { %v2517_v10 = vmax.f32 %v717_v6, %v721_v8  ;;  %2176 = vmatprep.subr.bf16.mxu1 %v2175_v9  ;;  %v1794_v6 = vld [vmem:[%s2682_s2 + $0x90] sm:$0xff]  ;;  %v1804_v8 = vld [vmem:[%s2682_s2 + $0xa0] sm:$0xff] }
 0x2fd   : > { %2178 = vmatpush3.bf16.msra.mxu1 %v2175_v9  ;;  %v1019_v9 = vpop.permute.xlu1 %1018 }
 0x2fe   : > { %v2179_v12 = vpack.c.bf16 %v2515_v11, %v2517_v10 }
 0x2ff   : > { %v875_v44 = vpop.permute.xlu0 %874 }
 0x300   : > { %2180 = vmatprep.subr.bf16.mxu1 %v2179_v12 }
 0x301   : > { %2182 = vmatpush3.bf16.msra.mxu1 %v2179_v12 }
 0x303   : > { %v885_v53 = vpop.permute.xlu0 %884 }
 0x304   : > { %2018 = vmatmul.mubr.msk.f32.vlgmr.msra.gmra.mrb[8].mxu1 %vm482_vm2, %v1769_v13 }
 0x305   : > { %2020 = vmatprep.mubr.msk.f32.mxu1 %vm482_vm2, %v1770_v14 }
 0x308   : > { %2021 = vmatmul.mubr.msk.f32.gmra.mrb[10].mxu1 %vm482_vm2, %v1771_v15 }
 0x309   : > { %2031 = vmatprep.mubr.msk.f32.mxu1 %vm482_vm2, %v1780_v16  ;;  %v1029_v16 = vpop.permute.xlu1 %1028 }
 0x3d7   : > { %v2019_v19 = vpop.f32.mrb[8].mxu1 }
 0x3d8   : > { %v841_v20 = vadd.f32 %v2019_v19, %v745_v17  ;;  %v835_v21 = vpop.f32.mrb[9].mxu1 }
 0x3d9   : > { %v836_v22 = vadd.f32 %v835_v21, %v740_v18 }
 0x3da   : > { %v855_v23 = vmul.f32 0.1, %v841_v20 }
 0x3db   : > { %v854_v25 = vmul.f32 0.1, %v836_v22  ;;  %v2022_v26 = vpop.f32.mrb[10].mxu1 }
 0x3dc   : > { %v859_v28 = vmax.f32 %v841_v20, %v855_v23  ;;  %v851_v29 = vadd.f32 %v2022_v26, %v755_v24  ;;  %v845_v30 = vpop.f32.mrb[11].mxu1 }
 0x3dd   : > { %v858_v31 = vmax.f32 %v836_v22, %v854_v25  ;;  %v846_v32 = vadd.f32 %v845_v30, %v750_v27 }
 0x3de   : > { %v857_v33 = vmul.f32 0.1, %v851_v29 }
 0x3df   : > { %v856_v34 = vmul.f32 0.1, %v846_v32  ;;  %v2183_v35 = vpack.c.bf16 %v859_v28, %v858_v31  ;;  %v1805_v31 = vld [vmem:[%s2682_s2 + $0xa8] sm:$0xff] }
 0x3e0   : > { %v861_v36 = vmax.f32 %v851_v29, %v857_v33  ;;  %v1807_v33 = vld [vmem:[%s2682_s2 + $0xb8] sm:$0xff] }
 0x3e1   : > { %v860_v37 = vmax.f32 %v846_v32, %v856_v34  ;;  %2184 = vmatprep.subr.bf16.mxu1 %v2183_v35  ;;  %v1806_v32 = vld [vmem:[%s2682_s2 + $0xb0] sm:$0xff]  ;;  %v1816_v34 = vld [vmem:[%s2682_s2 + $0xc0] sm:$0xff] }
 0x3e2   : > { %2186 = vmatpush3.bf16.msra.mxu1 %v2183_v35  ;;  %v1154_v35 = vpop.permute.xlu1 %1153 }
 0x3e3   : > { %v2187_v38 = vpack.c.bf16 %v861_v36, %v860_v37 }
 0x3e5   : > { %2188 = vmatprep.subr.bf16.mxu1 %v2187_v38 }
 0x3e6   : > { %2190 = vmatpush3.bf16.msra.mxu1 %v2187_v38 }
 0x3e9   : > { %2032 = vmatmul.mubr.msk.f32.vlgmr.msra.gmra.mrb[12].mxu1 %vm482_vm2, %v1781_v39 }
 0x3ea   : > { %2034 = vmatprep.mubr.msk.f32.mxu1 %vm482_vm2, %v1782_v40 }
 0x3ed   : > { %2035 = vmatmul.mubr.msk.f32.gmra.mrb[14].mxu1 %vm482_vm2, %v1783_v41 }
 0x3ee   : > { %2045 = vmatprep.mubr.msk.f32.mxu1 %vm482_vm2, %v1792_v42  ;;  %v1164_v42 = vpop.permute.xlu1 %1163 }
 0x4bc   : > { %v2033_v45 = vpop.f32.mrb[12].mxu1 }
 0x4bd   : > { %v976_v46 = vadd.f32 %v2033_v45, %v880_v43  ;;  %v970_v47 = vpop.f32.mrb[13].mxu1 }
 0x4be   : > { %v971_v48 = vadd.f32 %v970_v47, %v875_v44 }
 0x4bf   : > { %v990_v49 = vadd.f32 %v976_v46, %v724_v3 }
 0x4c0   : > { %v989_v51 = vadd.f32 %v971_v48, %v723_v5  ;;  %v2036_v52 = vpop.f32.mrb[14].mxu1  ;;  %v1793_v5 = vld [vmem:[%s2682_s2 + $0x88] sm:$0xff] }
 0x4c1   : > { %v994_v54 = vmul.f32 0.1, %v990_v49  ;;  %v986_v55 = vadd.f32 %v2036_v52, %v890_v50  ;;  %v980_v56 = vpop.f32.mrb[15].mxu1 }
 0x4c2   : > { %v993_v57 = vmul.f32 0.1, %v989_v51  ;;  %v981_v58 = vadd.f32 %v980_v56, %v885_v53 }
 0x4c3   : > { %v998_v59 = vmax.f32 %v990_v49, %v994_v54  ;;  %v992_v60 = vadd.f32 %v986_v55, %v2515_v11  ;;  %v1014_v11 = vpop.permute.xlu0 %1013 }
 0x4c4   : > { %v997_v61 = vmax.f32 %v989_v51, %v993_v57  ;;  %v991_v62 = vadd.f32 %v981_v58, %v2517_v10 }
 0x4c5   : > { %v996_v63 = vmul.f32 0.1, %v992_v60 }
 0x4c6   : > { %v995_v0 = vmul.f32 0.1, %v991_v62  ;;  %v2191_v1 = vpack.c.bf16 %v998_v59, %v997_v61 }
 0x4c7   : > { %v2555_v2 = vmax.f32 %v992_v60, %v996_v63  ;;  %v1024_v19 = vpop.permute.xlu0 %1023  ;;  %v1819_v63 = vld [vmem:[%s2682_s2 + $0xd8] sm:$0xff] }
 0x4c8   : > { %v2557_v3 = vmax.f32 %v991_v62, %v995_v0  ;;  %2192 = vmatprep.subr.bf16.mxu1 %v2191_v1  ;;  %v1818_v62 = vld [vmem:[%s2682_s2 + $0xd0] sm:$0xff]  ;;  %v1442_v0 = vld [vmem:[%s2683_s3] sm:$0xff] }
 0x4c9   : > { %2194 = vmatpush3.bf16.msra.mxu1 %v2191_v1  ;;  %v1443_v1 = vld [vmem:[%s2683_s3 + $0x8] sm:$0xff] }
 0x4ca   : > { %v2195_v4 = vpack.c.bf16 %v2555_v2, %v2557_v3 }
 0x4cb   : > { %v1149_v36 = vpop.permute.xlu0 %1148 }
 0x4cc   : > { %2196 = vmatprep.subr.bf16.mxu1 %v2195_v4 }
 0x4cd   : > { %2198 = vmatpush3.bf16.msra.mxu1 %v2195_v4 }
 0x4cf   : > { %v1159_v45 = vpop.permute.xlu0 %1158 }
 0x4d0   : > { %2046 = vmatmul.mubr.msk.f32.vlgmr.msra.gmra.mrb[16].mxu1 %vm482_vm2, %v1793_v5  ;;  %v1293_v5 = vpop.permute.xlu1 %1292 }
 0x4d1   : > { %2048 = vmatprep.mubr.msk.f32.mxu1 %vm482_vm2, %v1794_v6 }
 0x4d4   : > { %2049 = vmatmul.mubr.msk.f32.gmra.mrb[18].mxu1 %vm482_vm2, %v1795_v7 }
 0x4d5   : > { %2059 = vmatprep.mubr.msk.f32.mxu1 %vm482_vm2, %v1804_v8 }
 0x5a3   : > { %v2047_v10 = vpop.f32.mrb[16].mxu1 }
 0x5a4   : > { %v1115_v12 = vadd.f32 %v2047_v10, %v1019_v9  ;;  %v1109_v13 = vpop.f32.mrb[17].mxu1 }
 0x5a5   : > { %v1110_v14 = vadd.f32 %v1109_v13, %v1014_v11 }
 0x5a6   : > { %v1129_v15 = vmul.f32 0.1, %v1115_v12 }
 0x5a7   : > { %v1128_v17 = vmul.f32 0.1, %v1110_v14  ;;  %v2050_v18 = vpop.f32.mrb[18].mxu1 }
 0x5a8   : > { %v1133_v20 = vmax.f32 %v1115_v12, %v1129_v15  ;;  %v1125_v21 = vadd.f32 %v2050_v18, %v1029_v16  ;;  %v1119_v22 = vpop.f32.mrb[19].mxu1  ;;  %v1444_v16 = vld [vmem:[%s2683_s3 + $0x10] sm:$0xff] }
 0x5a9   : > { %v1132_v23 = vmax.f32 %v1110_v14, %v1128_v17  ;;  %v1120_v24 = vadd.f32 %v1119_v22, %v1024_v19  ;;  %v1445_v17 = vld [vmem:[%s2683_s3 + $0x18] sm:$0xff]  ;;  %v1303_v19 = vpop.permute.xlu1 %1302 }
 0x5aa   : > { %v1131_v25 = vmul.f32 0.1, %v1125_v21  ;;  %v2219_v18 = vpack.c.bf16 %v1445_v17, %v1444_v16 }
 0x5ab   : > { %v1130_v26 = vmul.f32 0.1, %v1120_v24  ;;  %v2199_v27 = vpack.c.bf16 %v1133_v20, %v1132_v23 }
 0x5ac   : > { %v1135_v28 = vmax.f32 %v1125_v21, %v1131_v25 }
 0x5ad   : > { %v1134_v29 = vmax.f32 %v1120_v24, %v1130_v26  ;;  %2200 = vmatprep.subr.bf16.mxu1 %v2199_v27 }
 0x5ae   : > { %2202 = vmatpush3.bf16.msra.mxu1 %v2199_v27 }
 0x5af   : > { %v2203_v30 = vpack.c.bf16 %v1135_v28, %v1134_v29 }
 0x5b1   : > { %2204 = vmatprep.subr.bf16.mxu1 %v2203_v30 }
 0x5b2   : > { %2206 = vmatpush3.bf16.msra.mxu1 %v2203_v30 }
 0x5b5   : > { %2060 = vmatmul.mubr.msk.f32.vlgmr.msra.gmra.mrb[20].mxu1 %vm482_vm2, %v1805_v31 }
 0x5b6   : > { %2062 = vmatprep.mubr.msk.f32.mxu1 %vm482_vm2, %v1806_v32 }
 0x5b9   : > { %2063 = vmatmul.mubr.msk.f32.gmra.mrb[22].mxu1 %vm482_vm2, %v1807_v33 }
 0x5ba   : > { %2073 = vmatprep.mubr.msk.f32.mxu1 %vm482_vm2, %v1816_v34 }
 0x688   : > { %v2061_v37 = vpop.f32.mrb[20].mxu1 }
 0x689   : > { %v1250_v38 = vadd.f32 %v2061_v37, %v1154_v35  ;;  %v1244_v39 = vpop.f32.mrb[21].mxu1 }
 0x68a   : > { %v1245_v40 = vadd.f32 %v1244_v39, %v1149_v36 }
 0x68b   : > { %v1264_v41 = vadd.f32 %v1250_v38, %v998_v59 }
 0x68c   : > { %v1263_v43 = vadd.f32 %v1245_v40, %v997_v61  ;;  %v2064_v44 = vpop.f32.mrb[22].mxu1  ;;  %v1817_v61 = vld [vmem:[%s2682_s2 + $0xc8] sm:$0xff] }
 0x68d   : > { %v1268_v46 = vmul.f32 0.1, %v1264_v41  ;;  %v1260_v47 = vadd.f32 %v2064_v44, %v1164_v42  ;;  %v1254_v48 = vpop.f32.mrb[23].mxu1  ;;  %v1828_v42 = vld [vmem:[%s2685_s5] ss:$0 sm:$0xff] }
 0x68e   : > { %v1267_v49 = vmul.f32 0.1, %v1263_v43  ;;  %v1255_v50 = vadd.f32 %v1254_v48, %v1159_v45 }
 0x68f   : > { %v1272_v51 = vmax.f32 %v1264_v41, %v1268_v46  ;;  %v1266_v52 = vadd.f32 %v1260_v47, %v2555_v2  ;;  %v2215_v2 = vpack.c.bf16 %v1443_v1, %v1442_v0 }
 0x690   : > { %v1271_v53 = vmax.f32 %v1263_v43, %v1267_v49  ;;  %v1265_v54 = vadd.f32 %v1255_v50, %v2557_v3  ;;  %v1288_v3 = vpop.permute.xlu0 %1287 }
 0x691   : > { %v1270_v55 = vmul.f32 0.1, %v1266_v52  ;;  %2216 = vmatprep.subr.bf16.mxu0 %v2215_v2 }
 0x692   : > { %v1269_v56 = vmul.f32 0.1, %v1265_v54  ;;  %v2207_v57 = vpack.c.bf16 %v1272_v51, %v1271_v53  ;;  %2218 = vmatpush3.bf16.msra.mxu0 %v2215_v2 }
 0x693   : > { %v1274_v58 = vmax.f32 %v1266_v52, %v1270_v55  ;;  %2220 = vmatprep.subr.bf16.mxu0 %v2219_v18 }
 0x694   : > { %v1273_v59 = vmax.f32 %v1265_v54, %v1269_v56  ;;  %2208 = vmatprep.subr.bf16.mxu1 %v2207_v57  ;;  %v1298_v10 = vpop.permute.xlu0 %1297 }
 0x695   : > { %2210 = vmatpush3.bf16.msra.mxu1 %v2207_v57 }
 0x696   : > { %v2211_v60 = vpack.c.bf16 %v1274_v58, %v1273_v59  ;;  %2222 = vmatpush3.bf16.msra.mxu0 %v2219_v18 }
 0x698   : > { %2212 = vmatprep.subr.bf16.mxu1 %v2211_v60 }
 0x699   : > { %2214 = vmatpush3.bf16.msra.mxu1 %v2211_v60 }
 0x69a   : > { %2223 = vmatprep.subr.bf16.mxu1 %v2215_v2 }
 0x69c   : > { %2074 = vmatmul.mubr.msk.f32.vlgmr.msra.gmra.mrb[24].mxu1 %vm482_vm2, %v1817_v61 }
 0x69d   : > { %2076 = vmatprep.mubr.msk.f32.mxu1 %vm482_vm2, %v1818_v62  ;;  %2225 = vmatpush3.bf16.msra.mxu1 %v2215_v2 }
 0x69e   : > { %2224 = vmatprep.subr.bf16.mxu1 %v2219_v18 }
 0x6a0   : > { %2077 = vmatmul.mubr.msk.f32.gmra.mrb[26].mxu1 %vm482_vm2, %v1819_v63 }
 0x6a1   : > { %2226 = vmatpush3.bf16.msra.mxu1 %v2219_v18 }
 0x76f   : > { %v2075_v4 = vpop.f32.mrb[24].mxu1 }
 0x770   : > { %v1383_v6 = vpop.f32.mrb[25].mxu1  ;;  %v1389_v7 = vadd.f32 %v2075_v4, %v1293_v5 }
 0x771   : > { %v1384_v8 = vadd.f32 %v1383_v6, %v1288_v3 }
 0x772   : > { %v1403_v13 = vmul.f32 0.1, %v1389_v7 }
 0x773   : > { %v1402_v9 = vmul.f32 0.1, %v1384_v8  ;;  %v2078_v11 = vpop.f32.mrb[26].mxu1 }
 0x774   : > { %v1393_v12 = vpop.f32.mrb[27].mxu1  ;;  %v1407_v20 = vmax.f32 %v1389_v7, %v1403_v13  ;;  %v1399_v21 = vadd.f32 %v2078_v11, %v1303_v19 }
 0x775   : > { %v1406_v14 = vmax.f32 %v1384_v8, %v1402_v9  ;;  %v1394_v15 = vadd.f32 %v1393_v12, %v1298_v10 }
 0x776   : > { %v1405_v23 = vmul.f32 0.1, %v1399_v21 }
 0x777   : > { %1410 = vxpose.xlu0.b32.start [1/4] (short) %v1406_v14, 128  ;;  %v1404_v22 = vmul.f32 0.1, %v1394_v15 }
 0x778   : > { %v1409_v25 = vmax.f32 %v1399_v21, %v1405_v23 }
 0x779   : > { %v1408_v24 = vmax.f32 %v1394_v15, %v1404_v22 }
 0x77b   : > { %1411 = vxpose.xlu0.b32.cont [2/4] (short) %v1407_v20, 128 }
 0x77f   : > { %1412 = vxpose.xlu0.b32.cont [3/4] (short) %v1408_v24, 128 }
 0x783   : > { %1413 = vxpose.xlu0.b32.end [4/4] (short) %v1409_v25, 128 }
 0x7f7   : > { %v1426_v26 = vpop.trf.xlu0 }
 0x7f8   : > { %2087 = vmatprep.mubr.msk.f32.mxu0 %vm482_vm2, %v1426_v26 }
 0x7fb   : > { %v1427_v27 = vpop.trf.xlu0 }
 0x7fc   : > { %2088 = vmatmul.mubr.msk.f32.vlgmr.msra.gmra.mrb[4].mxu0 %vm482_vm2, %v1427_v27 }
 0x7ff   : > { %v1428_v28 = vpop.trf.xlu0 }
 0x800   : > { %2090 = vmatprep.mubr.msk.f32.mxu0 %vm482_vm2, %v1428_v28 }
 0x803   : > { %v1429_v29 = vpop.trf.xlu0 }
 0x804   : > { %2091 = vmatmul.mubr.msk.f32.gmra.mrb[6].mxu0 %vm482_vm2, %v1429_v29 }
 0x807   : > { %v1430_v30 = vpop.trf.xlu0 }
 0x808   : > { %2093 = vmatprep.mubr.msk.f32.mxu0 %vm482_vm2, %v1430_v30 }
 0x80b   : > { %v1431_v31 = vpop.trf.xlu0 }
 0x80c   : > { %2094 = vmatmul.mubr.msk.f32.gmra.mrb[8].mxu0 %vm482_vm2, %v1431_v31 }
 0x80f   : > { %v1432_v32 = vpop.trf.xlu0 }
 0x810   : > { %2096 = vmatprep.mubr.msk.f32.mxu1 %vm482_vm2, %v1432_v32 }
 0x813   : > { %v1433_v33 = vpop.trf.xlu0 }
 0x814   : > { %2097 = vmatmul.mubr.msk.f32.vlgmr.msra.gmra.mrb[28].mxu1 %vm482_vm2, %v1433_v33 }
 0x817   : > { %v1434_v34 = vpop.trf.xlu0 }
 0x818   : > { %2099 = vmatprep.mubr.msk.f32.mxu1 %vm482_vm2, %v1434_v34 }
 0x81b   : > { %v1435_v35 = vpop.trf.xlu0 }
 0x81c   : > { %2100 = vmatmul.mubr.msk.f32.gmra.mrb[30].mxu1 %vm482_vm2, %v1435_v35 }
 0x81f   : > { %v1436_v36 = vpop.trf.xlu0 }
 0x820   : > { %2102 = vmatprep.mubr.msk.f32.mxu1 %vm482_vm2, %v1436_v36 }
 0x823   : > { %v1437_v37 = vpop.trf.xlu0 }
 0x824   : > { %2103 = vmatmul.mubr.msk.f32.gmra.mrb[32].mxu1 %vm482_vm2, %v1437_v37 }
 0x827   : > { %v1438_v38 = vpop.trf.xlu0 }
 0x828   : > { %2105 = vmatprep.mubr.msk.f32.mxu1 %vm482_vm2, %v1438_v38 }
 0x82b   : > { %v1439_v39 = vpop.trf.xlu0 }
 0x82c   : > { %2106 = vmatmul.mubr.msk.f32.gmra.mrb[34].mxu1 %vm482_vm2, %v1439_v39 }
 0x82f   : > { %v1440_v40 = vpop.trf.xlu0 }
 0x830   : > { %2108 = vmatprep.mubr.msk.f32.mxu1 %vm482_vm2, %v1440_v40 }
 0x833   : > { %v1441_v41 = vpop.trf.xlu0 }
 0x834   : > { %2109 = vmatmul.mubr.msk.f32.gmra.mrb[36].mxu1 %vm482_vm2, %v1441_v41 }
 0x8cf   : > { %v2089_v43 = vpop.f32.mrb[4].mxu0 }
 0x8d0   : > { %v1573_v44 = vadd.f32 %v2089_v43, %v1828_v42  ;;  %v1567_v45 = vpop.f32.mrb[5].mxu0 }
 0x8d1   : > { %v1568_v46 = vadd.f32 %v1828_v42, %v1567_v45 }
 0x8d2   : > { %1648 = vst.msk [vmem:[%s2643_s20 + $0x8] sm:$0xff] %vm1646_vm3, %v1573_v44 }
 0x8d3   : > { %1647 = vst.msk [vmem:[%s2643_s20] sm:$0xff] %vm1646_vm3, %v1568_v46 }
 0x8d7   : > { %v2092_v47 = vpop.f32.mrb[6].mxu0 }
 0x8d8   : > { %v1583_v48 = vadd.f32 %v2092_v47, %v1828_v42  ;;  %v1577_v49 = vpop.f32.mrb[7].mxu0 }
 0x8d9   : > { %v1578_v50 = vadd.f32 %v1828_v42, %v1577_v49 }
 0x8da   : > { %1650 = vst.msk [vmem:[%s2643_s20 + $0x18] sm:$0xff] %vm1646_vm3, %v1583_v48 }
 0x8db   : > { %1649 = vst.msk [vmem:[%s2643_s20 + $0x10] sm:$0xff] %vm1646_vm3, %v1578_v50 }
 0x8df   : > { %v2095_v51 = vpop.f32.mrb[8].mxu0 }
 0x8e0   : > { %v1593_v52 = vadd.f32 %v2095_v51, %v1828_v42  ;;  %v1587_v53 = vpop.f32.mrb[9].mxu0 }
 0x8e1   : > { %v1588_v54 = vadd.f32 %v1828_v42, %v1587_v53 }
 0x8e2   : > { %1652 = vst.msk [vmem:[%s2643_s20 + $0x28] sm:$0xff] %vm1646_vm3, %v1593_v52 }
 0x8e3   : > { %1651 = vst.msk [vmem:[%s2643_s20 + $0x20] sm:$0xff] %vm1646_vm3, %v1588_v54 }
 0x8e7   : > { %v2098_v55 = vpop.f32.mrb[28].mxu1 }
 0x8e8   : > { %v1603_v56 = vadd.f32 %v2098_v55, %v1828_v42  ;;  %v1597_v57 = vpop.f32.mrb[29].mxu1 }
 0x8e9   : > { %v1598_v58 = vadd.f32 %v1828_v42, %v1597_v57 }
 0x8ea   : > { %1654 = vst.msk [vmem:[%s2643_s20 + $0x38] sm:$0xff] %vm1646_vm3, %v1603_v56 }
 0x8eb   : > { %1653 = vst.msk [vmem:[%s2643_s20 + $0x30] sm:$0xff] %vm1646_vm3, %v1598_v58 }
 0x8ef   : > { %v2101_v59 = vpop.f32.mrb[30].mxu1 }
 0x8f0   : > { %v1613_v60 = vadd.f32 %v2101_v59, %v1828_v42  ;;  %v1607_v61 = vpop.f32.mrb[31].mxu1 }
 0x8f1   : > { %v1608_v62 = vadd.f32 %v1828_v42, %v1607_v61 }
 0x8f2   : > { %1656 = vst.msk [vmem:[%s2643_s20 + $0x48] sm:$0xff] %vm1646_vm3, %v1613_v60 }
 0x8f3   : > { %1655 = vst.msk [vmem:[%s2643_s20 + $0x40] sm:$0xff] %vm1646_vm3, %v1608_v62 }
 0x8f7   : > { %v2104_v63 = vpop.f32.mrb[32].mxu1 }
 0x8f8   : > { %v1623_v0 = vadd.f32 %v2104_v63, %v1828_v42  ;;  %v1617_v1 = vpop.f32.mrb[33].mxu1 }
 0x8f9   : > { %v1618_v2 = vadd.f32 %v1828_v42, %v1617_v1 }
 0x8fa   : > { %1658 = vst.msk [vmem:[%s2643_s20 + $0x58] sm:$0xff] %vm1646_vm3, %v1623_v0 }
 0x8fb   : > { %1657 = vst.msk [vmem:[%s2643_s20 + $0x50] sm:$0xff] %vm1646_vm3, %v1618_v2 }
 0x8ff   : > { %v2107_v3 = vpop.f32.mrb[34].mxu1 }
 0x900   : > { %v1633_v4 = vadd.f32 %v2107_v3, %v1828_v42  ;;  %v1627_v5 = vpop.f32.mrb[35].mxu1 }
 0x901   : > { %v1628_v6 = vadd.f32 %v1828_v42, %v1627_v5 }
 0x902   : > { %1660 = vst.msk [vmem:[%s2643_s20 + $0x68] sm:$0xff] %vm1646_vm3, %v1633_v4 }
 0x903   : > { %1659 = vst.msk [vmem:[%s2643_s20 + $0x60] sm:$0xff] %vm1646_vm3, %v1628_v6 }
 0x907   : > { %v2110_v7 = vpop.f32.mrb[36].mxu1 }
 0x908   : > { %v1643_v8 = vadd.f32 %v2110_v7, %v1828_v42  ;;  %v1637_v9 = vpop.f32.mrb[37].mxu1 }
 0x909   : > { %v1638_v11 = vadd.f32 %v1828_v42, %v1637_v9 }
 0x90a   : > { %1662 = vst.msk [vmem:[%s2643_s20 + $0x78] sm:$0xff] %vm1646_vm3, %v1643_v8 }
 0x90b   : > { %1661 = vst.msk [vmem:[%s2643_s20 + $0x70] sm:$0xff] %vm1646_vm3, %v1638_v11 }
 0x90c PF: > { %s16_s21 = sadd.s32 1, %s2245_s21  }
 0x90d   : > { %p13_p4 = scmp.ge.s32.totalorder %s16_s21, 4  }
 0x90f   :  { %15 = sbr.rel (!%p13_p4) target bundleno = 1 (0x1), region = 87 }

</bundles_post_ra>
